<compile_context>
chip_gen: v6e
topology: v6e:2x2x1
jax: 0.10.0
libtpu: 0.0.40
codegen_flags: <defaults>
</compile_context>

<pallas_src>
import functools

import jax
import jax.numpy as jnp
from jax.experimental import pallas as pl
from jax.experimental.pallas import tpu as pltpu


def _mlp_kernel(x_ref, w1_ref, b1_ref, w2_ref, b2_ref, w3_ref, b3_ref, o_ref):
    """Fused 3-layer MLP: Linear->ReLU->Linear->ReLU->Linear on one batch tile."""
    x = x_ref[...]
    h1 = jnp.dot(x, w1_ref[...], preferred_element_type=jnp.float32) + b1_ref[...]
    h1 = jnp.maximum(h1, 0.0)
    h2 = jnp.dot(h1, w2_ref[...], preferred_element_type=jnp.float32) + b2_ref[...]
    h2 = jnp.maximum(h2, 0.0)
    out = jnp.dot(h2, w3_ref[...], preferred_element_type=jnp.float32) + b3_ref[...]
    o_ref[...] = out.astype(o_ref.dtype)


def _auto_block_b(B):
    """Pick a large batch tile (amortize per-step overhead) while keeping
    >=2 grid steps when the batch is big enough (v7x has 2 TensorCores)."""
    if B <= 16:
        # One tile covering the whole (tiny) batch. block dim == full dim,
        # so the (8, ...) divisibility constraint does not apply.
        return B
    cap = 2048
    if B >= 2 * cap:
        return cap
    half = -(-B // 2)                    # ceil(B / 2) -> at least 2 grid steps
    blk = ((half + 7) // 8) * 8          # round up to sublane multiple of 8
    return min(blk, cap)


@functools.partial(jax.jit, static_argnames=("block_b",))
def cognitive_test_mlp(x, params, block_b=None):
    """Forward pass of CognitiveTestMLP.

    x: [B, MLP_in] float32
    params: dict with w1 [MLP_in,64], b1 [1,64], w2 [64,32], b2 [1,32],
            w3 [32,MLP_out], b3 [1,MLP_out]
    returns [B, MLP_out] float32
    """
    B, d_in = x.shape
    w1, b1 = params["w1"], params["b1"]
    w2, b2 = params["w2"], params["b2"]
    w3, b3 = params["w3"], params["b3"]
    d_h1 = w1.shape[1]
    d_h2 = w2.shape[1]
    d_out = w3.shape[1]

    if block_b is None:
        block_b = _auto_block_b(B)

    grid = (pl.cdiv(B, block_b),)

    # Weights/biases are tiny (<40 KiB total); constant block index keeps them
    # resident in VMEM across all grid steps (no re-DMA).
    full = lambda shape: pl.BlockSpec(shape, lambda i: (0,) * len(shape))

    return pl.pallas_call(
        _mlp_kernel,
        out_shape=jax.ShapeDtypeStruct((B, d_out), jnp.float32),
        grid_spec=pltpu.PrefetchScalarGridSpec(
            num_scalar_prefetch=0,
            grid=grid,
            in_specs=[
                pl.BlockSpec((block_b, d_in), lambda i: (i, 0)),  # x tile over batch
                full((d_in, d_h1)),
                full((1, d_h1)),
                full((d_h1, d_h2)),
                full((1, d_h2)),
                full((d_h2, d_out)),
                full((1, d_out)),
            ],
            out_specs=pl.BlockSpec((block_b, d_out), lambda i: (i, 0)),
        ),
        compiler_params=pltpu.CompilerParams(
            dimension_semantics=("parallel",),
            # x/out tiles pad last dim to 128 lanes: ~block_b * 2 KiB of
            # double-buffered VMEM at the largest tile (~4-5 MiB @ 2048).
            # 32 MiB is safely within scoped limits on v5e/v6e/v7x.
            vmem_limit_bytes=32 * 1024 * 1024,
        ),
    )(x, w1, b1, w2, b2, w3, b3)


def init_params(key, mlp_in, mlp_out):
    """Deterministic init matching nn.Linear default: U(-1/sqrt(fan_in), 1/sqrt(fan_in))."""
    dims = [(mlp_in, 64), (64, 32), (32, mlp_out)]
    params = {}
    for idx, (fan_in, fan_out) in enumerate(dims, start=1):
        key, kw, kb = jax.random.split(key, 3)
        bound = 1.0 / jnp.sqrt(jnp.float32(fan_in))
        params[f"w{idx}"] = jax.random.uniform(
            kw, (fan_in, fan_out), jnp.float32, -bound, bound
        )
        params[f"b{idx}"] = jax.random.uniform(
            kb, (1, fan_out), jnp.float32, -bound, bound
        )
    return params


def _reference(x, params):
    h = jnp.maximum(x @ params["w1"] + params["b1"], 0.0)
    h = jnp.maximum(h @ params["w2"] + params["b2"], 0.0)
    return h @ params["w3"] + params["b3"]


if __name__ == "__main__":
    key = jax.random.PRNGKey(0)
    k_x, k_p, k_x2 = jax.random.split(key, 3)

    MLP_in, MLP_out = 16, 10
    params = init_params(k_p, MLP_in, MLP_out)

    # Small batch: single tile covering the whole batch.
    batch = 8
    x = jax.random.normal(k_x, (batch, MLP_in), jnp.float32)
    out = jax.block_until_ready(cognitive_test_mlp(x, params))
    ref = _reference(x, params)
    assert out.shape == (batch, MLP_out)
    assert jnp.allclose(out, ref, atol=1e-5, rtol=1e-5), "mismatch vs JAX reference (B=8)"

    # Larger batch: exercises multi-step grid + partial final tile masking.
    batch2 = 300
    x2 = jax.random.normal(k_x2, (batch2, MLP_in), jnp.float32)
    out2 = jax.block_until_ready(cognitive_test_mlp(x2, params))
    ref2 = _reference(x2, params)
    assert out2.shape == (batch2, MLP_out)
    assert jnp.allclose(out2, ref2, atol=1e-5, rtol=1e-5), "mismatch vs JAX reference (B=300)"

    print("KERNEL_OK")
</pallas_src>

<mosaic_0001>
module attributes {stable_mosaic.version = 11 : i64} {
  func.func @_mlp_kernel(%arg0: i32, %arg1: memref<8x16xf32, #tpu.memory_space<vmem>>, %arg2: memref<16x64xf32, #tpu.memory_space<vmem>>, %arg3: memref<1x64xf32, #tpu.memory_space<vmem>>, %arg4: memref<64x32xf32, #tpu.memory_space<vmem>>, %arg5: memref<1x32xf32, #tpu.memory_space<vmem>>, %arg6: memref<32x10xf32, #tpu.memory_space<vmem>>, %arg7: memref<1x10xf32, #tpu.memory_space<vmem>>, %arg8: memref<8x10xf32, #tpu.memory_space<vmem>>) attributes {dimension_semantics = [#tpu.dimension_semantics<parallel>], iteration_bounds = array<i64: 1>, scalar_prefetch = 0 : i64, scratch_operands = 0 : i64, tpu.core_type = #tpu.core_type<tc>, window_params = [{transform_indices = @transform_0, window_bounds = array<i64: 8, 16>}, {pipeline_mode = #tpu.pipeline_mode<synchronous>, transform_indices = @transform_1, window_bounds = array<i64: 16, 64>}, {pipeline_mode = #tpu.pipeline_mode<synchronous>, transform_indices = @transform_2, window_bounds = array<i64: 1, 64>}, {pipeline_mode = #tpu.pipeline_mode<synchronous>, transform_indices = @transform_3, window_bounds = array<i64: 64, 32>}, {pipeline_mode = #tpu.pipeline_mode<synchronous>, transform_indices = @transform_4, window_bounds = array<i64: 1, 32>}, {pipeline_mode = #tpu.pipeline_mode<synchronous>, transform_indices = @transform_5, window_bounds = array<i64: 32, 10>}, {pipeline_mode = #tpu.pipeline_mode<synchronous>, transform_indices = @transform_6, window_bounds = array<i64: 1, 10>}, {transform_indices = @transform_7, window_bounds = array<i64: 8, 10>}]} {
    %c0 = arith.constant 0 : index
    %c0_0 = arith.constant 0 : index
    %0 = vector.load %arg1[%c0, %c0_0] : memref<8x16xf32, #tpu.memory_space<vmem>>, vector<8x16xf32>
    %c0_1 = arith.constant 0 : index
    %c0_2 = arith.constant 0 : index
    %1 = vector.load %arg2[%c0_1, %c0_2] : memref<16x64xf32, #tpu.memory_space<vmem>>, vector<16x64xf32>
    %cst = arith.constant dense<0.000000e+00> : vector<8x64xf32>
    %2 = tpu.matmul %0, %1, %cst {dimension_numbers = #tpu.dot_dimension_numbers<[1], [0], [0], [1], [0, 0, 1, 1], [], []>} : vector<8x16xf32>, vector<16x64xf32>, vector<8x64xf32> -> vector<8x64xf32>
    %c0_3 = arith.constant 0 : index
    %c0_4 = arith.constant 0 : index
    %3 = vector.load %arg3[%c0_3, %c0_4] : memref<1x64xf32, #tpu.memory_space<vmem>>, vector<1x64xf32>
    %4 = vector.broadcast %3 : vector<1x64xf32> to vector<8x64xf32>
    %5 = arith.addf %2, %4 : vector<8x64xf32>
    %cst_5 = arith.constant 0.000000e+00 : f32
    %6 = vector.broadcast %cst_5 : f32 to vector<8x64xf32>
    %7 = arith.maximumf %5, %6 : vector<8x64xf32>
    %c0_6 = arith.constant 0 : index
    %c0_7 = arith.constant 0 : index
    %8 = vector.load %arg4[%c0_6, %c0_7] : memref<64x32xf32, #tpu.memory_space<vmem>>, vector<64x32xf32>
    %cst_8 = arith.constant dense<0.000000e+00> : vector<8x32xf32>
    %9 = tpu.matmul %7, %8, %cst_8 {dimension_numbers = #tpu.dot_dimension_numbers<[1], [0], [0], [1], [0, 0, 1, 1], [], []>} : vector<8x64xf32>, vector<64x32xf32>, vector<8x32xf32> -> vector<8x32xf32>
    %c0_9 = arith.constant 0 : index
    %c0_10 = arith.constant 0 : index
    %10 = vector.load %arg5[%c0_9, %c0_10] : memref<1x32xf32, #tpu.memory_space<vmem>>, vector<1x32xf32>
    %11 = vector.broadcast %10 : vector<1x32xf32> to vector<8x32xf32>
    %12 = arith.addf %9, %11 : vector<8x32xf32>
    %cst_11 = arith.constant 0.000000e+00 : f32
    %13 = vector.broadcast %cst_11 : f32 to vector<8x32xf32>
    %14 = arith.maximumf %12, %13 : vector<8x32xf32>
    %c0_12 = arith.constant 0 : index
    %c0_13 = arith.constant 0 : index
    %15 = vector.load %arg6[%c0_12, %c0_13] : memref<32x10xf32, #tpu.memory_space<vmem>>, vector<32x10xf32>
    %cst_14 = arith.constant dense<0.000000e+00> : vector<8x10xf32>
    %16 = tpu.matmul %14, %15, %cst_14 {dimension_numbers = #tpu.dot_dimension_numbers<[1], [0], [0], [1], [0, 0, 1, 1], [], []>} : vector<8x32xf32>, vector<32x10xf32>, vector<8x10xf32> -> vector<8x10xf32>
    %c0_15 = arith.constant 0 : index
    %c0_16 = arith.constant 0 : index
    %17 = vector.load %arg7[%c0_15, %c0_16] : memref<1x10xf32, #tpu.memory_space<vmem>>, vector<1x10xf32>
    %18 = vector.broadcast %17 : vector<1x10xf32> to vector<8x10xf32>
    %19 = arith.addf %16, %18 : vector<8x10xf32>
    %c0_17 = arith.constant 0 : index
    %c0_18 = arith.constant 0 : index
    %20 = vector.load %arg8[%c0_17, %c0_18] : memref<8x10xf32, #tpu.memory_space<vmem>>, vector<8x10xf32>
    tpu.vector_store %arg8[%c0_17, %c0_18], %19 {strides = array<i32>} : memref<8x10xf32, #tpu.memory_space<vmem>>, vector<8x10xf32>,
    return
  }
  func.func @transform_0(%arg0: i32) -> (i32, i32) {
    %c0_i32 = arith.constant 0 : i32
    %c0_i32_0 = arith.constant 0 : i32
    return %arg0, %c0_i32 : i32, i32
  }
  func.func @transform_1(%arg0: i32) -> (i32, i32) {
    %c0_i32 = arith.constant 0 : i32
    %c0_i32_0 = arith.constant 0 : i32
    %c0_i32_1 = arith.constant 0 : i32
    return %c0_i32, %c0_i32_0 : i32, i32
  }
  func.func @transform_2(%arg0: i32) -> (i32, i32) {
    %c0_i32 = arith.constant 0 : i32
    %c0_i32_0 = arith.constant 0 : i32
    %c0_i32_1 = arith.constant 0 : i32
    return %c0_i32, %c0_i32_0 : i32, i32
  }
  func.func @transform_3(%arg0: i32) -> (i32, i32) {
    %c0_i32 = arith.constant 0 : i32
    %c0_i32_0 = arith.constant 0 : i32
    %c0_i32_1 = arith.constant 0 : i32
    return %c0_i32, %c0_i32_0 : i32, i32
  }
  func.func @transform_4(%arg0: i32) -> (i32, i32) {
    %c0_i32 = arith.constant 0 : i32
    %c0_i32_0 = arith.constant 0 : i32
    %c0_i32_1 = arith.constant 0 : i32
    return %c0_i32, %c0_i32_0 : i32, i32
  }
  func.func @transform_5(%arg0: i32) -> (i32, i32) {
    %c0_i32 = arith.constant 0 : i32
    %c0_i32_0 = arith.constant 0 : i32
    %c0_i32_1 = arith.constant 0 : i32
    return %c0_i32, %c0_i32_0 : i32, i32
  }
  func.func @transform_6(%arg0: i32) -> (i32, i32) {
    %c0_i32 = arith.constant 0 : i32
    %c0_i32_0 = arith.constant 0 : i32
    %c0_i32_1 = arith.constant 0 : i32
    return %c0_i32, %c0_i32_0 : i32, i32
  }
  func.func @transform_7(%arg0: i32) -> (i32, i32) {
    %c0_i32 = arith.constant 0 : i32
    %c0_i32_0 = arith.constant 0 : i32
    return %arg0, %c0_i32 : i32, i32
  }
}

</mosaic_0001>

<bundles_post_ra>
// kernel: cognitive_test_mlp.1
= control target key start
LH: loop header
LB: loop body
LE: loop exit
PB: predicated region body
PF: predicated region fallthrough
CT: control target
= control target key end

     0   :  { %v388_v1 = vmov 0.0   ;;  %vm389_vm0 = vmmov 0   ;;  %vm37_vm1 = vcmask 130048   ;;  %s491_s0 = inlined_call_operand.vmem [shape: f32[8,16], index: 0, kind: input, shape index: {}]   ;;  %s492_s1 = inlined_call_operand.vmem [shape: f32[16,64], index: 1, kind: input, shape index: {}]   ;;  %s493_s2 = inlined_call_operand.vmem [shape: f32[1,64], index: 2, kind: input, shape index: {}]   ;;  %s494_s3 = inlined_call_operand.vmem [shape: f32[64,32], index: 3, kind: input, shape index: {}]   ;;  %s495_s4 = inlined_call_operand.vmem [shape: f32[1,32], index: 4, kind: input, shape index: {}]   ;;  %s496_s5 = inlined_call_operand.vmem [shape: f32[32,10], index: 5, kind: input, shape index: {}]   ;;  %s497_s6 = inlined_call_operand.vmem [shape: f32[1,10], index: 6, kind: input, shape index: {}]   ;;  %s498_s7 = inlined_call_operand.hbm [shape: f32[8,10], index: 7, kind: output, shape index: {}]  }
   0x1   :  { %v29_v0 = vld [vmem:[%s492_s1 + $0x8] sm:$0xff]  ;;  %326 = vmatprep.subr.mxu0 %v388_v1  ;;  %v28_v2 = vld [vmem:[%s492_s1] sm:$0xff]  ;;  %330 = vmatprep.mubr.msk.f32.mxu0 %vm389_vm0, %v388_v1  ;;  %v119_v3 = vld [vmem:[%s494_s3 + $0x38] sm:$0xff] }
   0x2   :  { %327 = vmatpush3.msra.mxu0 %v29_v0  ;;  %v27_v4 = vld [vmem:[%s491_s0] sm:$0xff]  ;;  %333 = vmatprep.subr.mxu1 %v388_v1  ;;  %v118_v5 = vld [vmem:[%s494_s3 + $0x30] sm:$0xff] }
   0x3   :  { %328 = vmatprep.subr.mxu0 %v388_v1  ;;  %334 = vmatpush3.msra.mxu1 %v119_v3 }
   0x4   :  { %12 = vsyncpa [#allocation3], 0  ;;  %329 = vmatpush3.msra.mxu0 %v28_v2  ;;  %335 = vmatprep.subr.mxu1 %v388_v1  ;;  %v117_v6 = vld [vmem:[%s494_s3 + $0x28] sm:$0xff]  ;;  %v116_v7 = vld [vmem:[%s494_s3 + $0x20] sm:$0xff]  ;;  %vm127_vm2 = vcmask 523264   ;;  %vm213_vm3 = vcmask 261120  }
   0x5   :  { %331 = vmatmul.mubr.msk.f32.vlgmr.msra.gmra.mxu0 %vm37_vm1, %v27_v4  ;;  %336 = vmatpush3.msra.mxu1 %v118_v5  ;;  %v115_v8 = vld [vmem:[%s494_s3 + $0x18] sm:$0xff]  ;;  %v114_v9 = vld [vmem:[%s494_s3 + $0x10] sm:$0xff]  ;;  %v113_v10 = vld [vmem:[%s494_s3 + $0x8] sm:$0xff]  ;;  %s390_s10 = smov [#allocation2]   ;;  %vm287_vm4 = vcmask 80896  }
   0x6   :  { %337 = vmatprep.subr.mxu1 %v388_v1  ;;  %349 = vmatprep.mubr.msk.f32.mxu1 %vm389_vm0, %v388_v1  ;;  %v112_v11 = vld [vmem:[%s494_s3] sm:$0xff]  ;;  %v205_v12 = vld [vmem:[%s496_s5 + $0x18] sm:$0xff]  ;;  %v204_v18 = vld [vmem:[%s496_s5 + $0x10] sm:$0xff]  ;;  %s295_s1 = sshll.u32 %s390_s10, 4  ;;  %s296_s1 = int_to_ptr.vmem [resolvable:$true] %s295_s1 }
   0x7   :  { %338 = vmatpush3.msra.mxu1 %v117_v6  ;;  %352 = vmatprep.subr.mxu0 %v388_v1  ;;  %v303_v13 = vld [vmem:[%s493_s2] ss:$0 sm:$0xff]  ;;  %v203_v19 = vld [vmem:[%s496_s5 + $0x8] sm:$0xff]  ;;  %p371_p1 = scmp.lt.s32.totalorder %s296_s1, %s296_s1 }
   0x8   :  { %339 = vmatprep.subr.mxu1 %v388_v1  ;;  %360 = vmatprep.mubr.msk.f32.mxu0 %vm389_vm0, %v388_v1  ;;  %v202_v20 = vld [vmem:[%s496_s5] sm:$0xff]  ;;  %s366_s5 = scalar_lea.vmem %s296_s1, 128 }
   0x9   :  { %340 = vmatpush3.msra.mxu1 %v116_v7  ;;  %353 = vmatpush3.msra.mxu0 %v205_v12  ;;  %v305_v21 = vld [vmem:[%s495_s4] ss:$0 sm:$0xff]  ;;  %p367_p0 = scmp.ne.s32.totalorder %s296_s1, %s366_s5  ;;  %p372_p2 = scmp.lt.s32.totalorder %s366_s5, %s366_s5 }
   0xa   :  { %341 = vmatprep.subr.mxu1 %v388_v1  ;;  %354 = vmatprep.subr.mxu0 %v388_v1  ;;  %v307_v26 = vld [vmem:[%s497_s6] ss:$0 sm:$0xff] }
   0xb   :  { %342 = vmatpush3.msra.mxu1 %v115_v8  ;;  %355 = vmatpush3.msra.mxu0 %v204_v18  ;;  %p373_p3 = por %p372_p2, %p371_p1 }
   0xc   :  { %343 = vmatprep.subr.mxu1 %v388_v1  ;;  %356 = vmatprep.subr.mxu0 %v388_v1 }
   0xd   :  { %344 = vmatpush3.msra.mxu1 %v114_v9  ;;  %357 = vmatpush3.msra.mxu0 %v203_v19  ;;  %p374_p4 = pnand %p373_p3, %p367_p0 }
   0xe   :  { %345 = vmatprep.subr.mxu1 %v388_v1  ;;  %358 = vmatprep.subr.mxu0 %v388_v1 }
   0xf   :  { %346 = vmatpush3.msra.mxu1 %v113_v10  ;;  %359 = vmatpush3.msra.mxu0 %v202_v20 }
  0x10   :  { %347 = vmatprep.subr.mxu1 %v388_v1 }
  0x11   :  { %348 = vmatpush3.msra.mxu1 %v112_v11 }
  0xc5   :  { %v107_v14 = vpop.f32.mrf.mxu0 }
  0xc6   :  { %v108_v15 = vadd.f32 %v303_v13, %v107_v14 }
  0xc7   :  { %v332_v16 = vpop.f32.mrf.mxu0 }
  0xc8   :  { %v111_v17 = vmax.f32 %v108_v15, 0.0 }
  0xca   :  { %350 = vmatmul.mubr.msk.f32.vlgmr.msra.gmra.mxu1 %vm127_vm2, %v111_v17 }
 0x18a   :  { %v197_v22 = vpop.f32.mrf.mxu1 }
 0x18b   :  { %v198_v23 = vadd.f32 %v305_v21, %v197_v22 }
 0x18c   :  { %v351_v24 = vpop.f32.mrf.mxu1 }
 0x18d   :  { %v201_v25 = vmax.f32 %v198_v23, 0.0 }
 0x18f   :  { %361 = vmatmul.mubr.msk.f32.vlgmr.msra.gmra.mxu0 %vm213_vm3, %v201_v25 }
 0x24f   :  { %v283_v27 = vpop.f32.mrf.mxu0 }
 0x250   :  { %v284_v28 = vadd.f32 %v307_v26, %v283_v27 }
 0x251   :  { %v362_v29 = vpop.f32.mrf.mxu0 }
 0x252   :  { %288 = vst.msk [vmem:[#allocation2] sm:$0xff] %vm287_vm4, %v284_v28 }
 0x253   :  { %377 = shalt.err (!%p374_p4)
}
 0x254   :  { %298 = dma.vmem_to_hbm [thread:$0]  %s296_s1, 128, %s498_s7, [#allocation3]  }
 0x255   :  { %386 = dma.done.wait [#allocation3], 128  }
 0x256   :  { %387 = vsyncadd [#allocation3], 4294967168 }
 0x257   :  { %302 = vsyncpa [#allocation3], 1 }

</bundles_post_ra>
